<compile_context>
chip_gen: v6e
topology: v6e:2x2x1
jax: 0.10.0
libtpu: 0.0.40
codegen_flags: <defaults>
</compile_context>

<pallas_src>
import jax
import jax.numpy as jnp
from jax.experimental import pallas as pl
from jax.experimental.pallas import tpu as pltpu


def _identity_kernel(x_hbm_ref, o_hbm_ref, copy_sem):
    # Single direct HBM->HBM DMA of the whole array. No VMEM bounce,
    # no vld/vst bundles, no grid.
    cp = pltpu.make_async_copy(x_hbm_ref, o_hbm_ref, copy_sem)
    cp.start()
    cp.wait()


def _pallas_identity_copy(x: jax.Array) -> jax.Array:
    """HBM->HBM DMA copy of `x` via a single pallas_call (no grid)."""
    nbytes = x.size * jnp.dtype(x.dtype).itemsize
    return pl.pallas_call(
        _identity_kernel,
        out_shape=jax.ShapeDtypeStruct(x.shape, x.dtype),
        in_specs=[pl.BlockSpec(memory_space=pl.ANY)],
        out_specs=pl.BlockSpec(memory_space=pl.ANY),
        scratch_shapes=[pltpu.SemaphoreType.DMA(())],
        cost_estimate=pl.CostEstimate(
            flops=0,
            transcendentals=0,
            bytes_accessed=2 * nbytes,  # read x + write o
        ),
    )(x)


def identity(x: jax.Array) -> jax.Array:
    """Identity forward pass (matches nn.Identity / `return x`).

    The production-optimal implementation is simply `return x`; the
    pallas_call below exists because a kernel is required. It is a single
    DMA-engine HBM->HBM copy, which is as close to free as a launched copy
    can be on any TPU generation.
    """
    if x.size == 0:
        # Nothing to copy; DMA of zero bytes is pointless.
        return x
    return _pallas_identity_copy(x)


if __name__ == "__main__":
    key = jax.random.PRNGKey(0)
    # Small NCL input consistent with the 1d module: batch=2, channels=4, length=16.
    shape = (2, 4, 16)
    x = jax.random.normal(key, shape, dtype=jnp.float32)

    y = identity(x)
    y = jax.block_until_ready(y)

    assert y.shape == shape
    assert y.dtype == jnp.float32
    # No aliasing / donation, so x is still valid to compare against directly.
    assert bool(jnp.all(y == x))

    print("KERNEL_OK")
</pallas_src>

<mosaic_0001>
module attributes {stable_mosaic.version = 11 : i64} {
  func.func @_identity_kernel(%arg0: memref<2x4x16xf32, #tpu.memory_space<any>>, %arg1: memref<2x4x16xf32, #tpu.memory_space<any>>, %arg2: memref<!tpu.dma_semaphore, #tpu.memory_space<semaphore_mem>>) attributes {dimension_semantics = [], scalar_prefetch = 0 : i64, scratch_operands = 1 : i64, tpu.core_type = #tpu.core_type<tc>} {
    tpu.enqueue_dma source(%arg0 : memref<2x4x16xf32, #tpu.memory_space<any>>) target(%arg1 : memref<2x4x16xf32, #tpu.memory_space<any>>) target_semaphore(%arg2 : memref<!tpu.dma_semaphore, #tpu.memory_space<semaphore_mem>>)
    tpu.wait_dma2 semaphore(%arg2 : memref<!tpu.dma_semaphore, #tpu.memory_space<semaphore_mem>>) src(%arg0 : memref<2x4x16xf32, #tpu.memory_space<any>>) dst(%arg1 : memref<2x4x16xf32, #tpu.memory_space<any>>)
    return
  }
}

</mosaic_0001>

<bundles_post_ra>
// kernel: tpu_custom_call.1
= control target key start
LH: loop header
LB: loop body
LE: loop exit
PB: predicated region body
PF: predicated region fallthrough
CT: control target
= control target key end

     0   :  { %s29_s6 = smov [#allocation2]   ;;  %s30_s7 = smov 131072   ;;  %s48_s0 = inlined_call_operand.hbm [shape: f32[2,4,16], index: 0, kind: input, shape index: {}]   ;;  %s49_s1 = inlined_call_operand.hbm [shape: f32[2,4,16], index: 1, kind: output, shape index: {}]  }
   0x1   :  { %s31_s8 = smov 0  }
   0x2   :  { %12 = dma.general %s48_s0, 128, %s49_s1, %s29_s6, %s30_s7, [#allocation4], %s31_s8, 0  }
   0x3   :  { %27 = dma.done.wait [#allocation2], 128 }
   0x4   :  { %28 = vsyncadd [#allocation2], 4294967168 }
   0x5   :  { %17 = vsyncmov [#allocation2] }
   0x8   :  { %s18_s13 = vpop.sfrf %17 }
   0x9   :  { %p23_p0 = scmp.ne.s32.totalorder %s18_s13, 0 }
   0xb   :  { %22 = shalt.err (%p23_p0)  }

</bundles_post_ra>
